<compile_context>
chip_gen: v5e
topology: v5e:2x2
jax: 0.10.0
libtpu: 0.0.40
codegen_flags: <defaults>
</compile_context>

<pallas_src>
import jax
import jax.numpy as jnp
from jax.experimental import pallas as pl
from jax.experimental.pallas import tpu as pltpu

# CartPole-v* dimensions implied by the module
N_STATES = 4
N_ACTIONS = 2
HIDDEN = 50

HIDDEN_PAD = 128       # lane-dense padded hidden width (zero fill, exact math)
OUT_PAD = 128          # lane-dense padded output width (unmasked vst)

# Row layout of the packed parameter slab (all offsets 8-sublane aligned).
_W1_ROW = 0                        # rows   0..3   : w1^T  (N_STATES, HIDDEN_PAD)
_B1_ROW = 8                        # row    8      : b1    (1, HIDDEN_PAD)
_B2_ROW = 16                       # row   16      : b2    (1, OUT_PAD)
_W2_ROW = 24                       # rows  24..151 : w2^T  (HIDDEN_PAD, OUT_PAD)
_SLAB_ROWS = _W2_ROW + HIDDEN_PAD  # 152


def dqn_kernel(x_ref, p_ref, o_ref):
    x = x_ref[...]                                        # (B, N_STATES) f32
    w1 = p_ref[_W1_ROW:_W1_ROW + N_STATES, :]             # (4, 128)
    b1 = p_ref[_B1_ROW:_B1_ROW + 1, :]                    # (1, 128)
    b2 = p_ref[_B2_ROW:_B2_ROW + 1, :]                    # (1, 128)
    w2 = p_ref[_W2_ROW:_W2_ROW + HIDDEN_PAD, :]           # (128, 128)

    # fc1 on the MXU: (B,4) @ (4,128) + b1, then ReLU on the VPU.
    h = jnp.dot(x, w1, preferred_element_type=jnp.float32) + b1
    h = jnp.maximum(h, 0.0)

    # fc2 on the MXU: (B,128) @ (128,128) + b2, lane-dense (B,128) store.
    o_ref[...] = jnp.dot(h, w2, preferred_element_type=jnp.float32) + b2


def prepare_params(w1, b1, w2, b2):
    """One-time conversion from PyTorch Linear layout to one packed VMEM slab.

    w1: (HIDDEN, N_STATES), b1: (HIDDEN,), w2: (N_ACTIONS, HIDDEN), b2: (N_ACTIONS,)
    Returns a (152, 128) f32 slab reused across all forward calls.
    """
    slab = jnp.zeros((_SLAB_ROWS, OUT_PAD), jnp.float32)
    slab = slab.at[_W1_ROW:_W1_ROW + N_STATES, :HIDDEN].set(
        jnp.asarray(w1, jnp.float32).T)
    slab = slab.at[_B1_ROW, :HIDDEN].set(jnp.asarray(b1, jnp.float32))
    slab = slab.at[_B2_ROW, :N_ACTIONS].set(jnp.asarray(b2, jnp.float32))
    slab = slab.at[_W2_ROW:_W2_ROW + HIDDEN, :N_ACTIONS].set(
        jnp.asarray(w2, jnp.float32).T)
    return slab


@jax.jit
def dqn_forward(x, params_slab):
    """Hot path. x: (B, N_STATES) f32, B a fixed multiple of 8.

    Returns the padded (B, OUT_PAD) Q buffer; columns >= N_ACTIONS are exactly 0
    (mask them with -inf before any max/argmax over the lane axis).
    """
    B = x.shape[0]
    flops = 2 * B * (N_STATES * HIDDEN_PAD + HIDDEN_PAD * OUT_PAD)
    bytes_accessed = 4 * (x.size + params_slab.size + B * OUT_PAD)
    return pl.pallas_call(
        dqn_kernel,
        out_shape=jax.ShapeDtypeStruct((B, OUT_PAD), jnp.float32),
        in_specs=[pl.BlockSpec(memory_space=pltpu.MemorySpace.VMEM),
                  pl.BlockSpec(memory_space=pltpu.MemorySpace.VMEM)],
        out_specs=pl.BlockSpec(memory_space=pltpu.MemorySpace.VMEM),
        cost_estimate=pl.CostEstimate(
            flops=flops, transcendentals=0, bytes_accessed=bytes_accessed),
    )(x, params_slab)


@jax.jit
def dqn_q_values(x, params_slab):
    """Original-module semantics: returns (B, N_ACTIONS) Q-values.

    Only use when the exact (B, 2) shape is required; the slice costs an extra
    XLA op after the Pallas call, so prefer dqn_forward() on the hot path.
    """
    return dqn_forward(x, params_slab)[:, :N_ACTIONS]


def init_params(key):
    """Synthetic init mirroring the module's __init__:
       weights ~ Normal(0, 0.1); biases use PyTorch Linear default
       Uniform(-1/sqrt(fan_in), 1/sqrt(fan_in))."""
    k1, k2, k3, k4 = jax.random.split(key, 4)
    w1 = 0.1 * jax.random.normal(k1, (HIDDEN, N_STATES), dtype=jnp.float32)
    bound1 = 1.0 / jnp.sqrt(jnp.float32(N_STATES))
    b1 = jax.random.uniform(k2, (HIDDEN,), minval=-bound1, maxval=bound1,
                            dtype=jnp.float32)
    w2 = 0.1 * jax.random.normal(k3, (N_ACTIONS, HIDDEN), dtype=jnp.float32)
    bound2 = 1.0 / jnp.sqrt(jnp.float32(HIDDEN))
    b2 = jax.random.uniform(k4, (N_ACTIONS,), minval=-bound2, maxval=bound2,
                            dtype=jnp.float32)
    return w1, b1, w2, b2


if __name__ == "__main__":
    key = jax.random.PRNGKey(0)
    kx, kp = jax.random.split(key)

    # Fixed, sublane-aligned minibatch (bucket B to avoid jit retraces).
    B = 32
    x = jax.random.normal(kx, (B, N_STATES), dtype=jnp.float32)
    w1, b1, w2, b2 = init_params(kp)

    # One-time layout prep (transpose + padding + single-slab packing).
    params_slab = prepare_params(w1, b1, w2, b2)

    # Hot path: one Pallas dispatch, padded lane-dense output, no post-slice.
    out_padded = dqn_forward(x, params_slab)
    out_padded = jax.block_until_ready(out_padded)

    # Pure-JAX reference for semantics (original PyTorch forward).
    ref = jnp.maximum(x @ w1.T + b1, 0.0) @ w2.T + b2

    out = out_padded[:, :N_ACTIONS]           # test-time slice only
    assert out_padded.shape == (B, OUT_PAD)
    assert out.shape == (B, N_ACTIONS)
    assert jnp.allclose(out, ref, atol=1e-4, rtol=1e-4)
    # Padded lanes must be exactly zero (so downstream masking is well-defined).
    assert jnp.all(out_padded[:, N_ACTIONS:] == 0.0)

    # Semantic-compat wrapper also works.
    out2 = jax.block_until_ready(dqn_q_values(x, params_slab))
    assert jnp.allclose(out2, ref, atol=1e-4, rtol=1e-4)

    print("KERNEL_OK")
</pallas_src>

<mosaic_0001>
module attributes {stable_mosaic.version = 11 : i64} {
  func.func @dqn_kernel(%arg0: memref<32x4xf32, #tpu.memory_space<vmem>>, %arg1: memref<152x128xf32, #tpu.memory_space<vmem>>, %arg2: memref<32x128xf32, #tpu.memory_space<vmem>>) attributes {dimension_semantics = [], scalar_prefetch = 0 : i64, scratch_operands = 0 : i64, tpu.core_type = #tpu.core_type<tc>} {
    %c0 = arith.constant 0 : index
    %c0_0 = arith.constant 0 : index
    %0 = vector.load %arg0[%c0, %c0_0] : memref<32x4xf32, #tpu.memory_space<vmem>>, vector<32x4xf32>
    %c0_1 = arith.constant 0 : index
    %c0_2 = arith.constant 0 : index
    %1 = vector.load %arg1[%c0_1, %c0_2] : memref<152x128xf32, #tpu.memory_space<vmem>>, vector<4x128xf32>
    %c8 = arith.constant 8 : index
    %c0_3 = arith.constant 0 : index
    %2 = vector.load %arg1[%c8, %c0_3] : memref<152x128xf32, #tpu.memory_space<vmem>>, vector<1x128xf32>
    %c16 = arith.constant 16 : index
    %c0_4 = arith.constant 0 : index
    %3 = vector.load %arg1[%c16, %c0_4] : memref<152x128xf32, #tpu.memory_space<vmem>>, vector<1x128xf32>
    %c24 = arith.constant 24 : index
    %c0_5 = arith.constant 0 : index
    %4 = vector.load %arg1[%c24, %c0_5] : memref<152x128xf32, #tpu.memory_space<vmem>>, vector<128x128xf32>
    %cst = arith.constant dense<0.000000e+00> : vector<32x128xf32>
    %5 = tpu.matmul %0, %1, %cst {dimension_numbers = #tpu.dot_dimension_numbers<[1], [0], [0], [1], [0, 0, 1, 1], [], []>} : vector<32x4xf32>, vector<4x128xf32>, vector<32x128xf32> -> vector<32x128xf32>
    %6 = vector.broadcast %2 : vector<1x128xf32> to vector<32x128xf32>
    %7 = arith.addf %5, %6 : vector<32x128xf32>
    %cst_6 = arith.constant 0.000000e+00 : f32
    %8 = vector.broadcast %cst_6 : f32 to vector<32x128xf32>
    %9 = arith.maximumf %7, %8 : vector<32x128xf32>
    %cst_7 = arith.constant dense<0.000000e+00> : vector<32x128xf32>
    %10 = tpu.matmul %9, %4, %cst_7 {dimension_numbers = #tpu.dot_dimension_numbers<[1], [0], [0], [1], [0, 0, 1, 1], [], []>} : vector<32x128xf32>, vector<128x128xf32>, vector<32x128xf32> -> vector<32x128xf32>
    %11 = vector.broadcast %3 : vector<1x128xf32> to vector<32x128xf32>
    %12 = arith.addf %10, %11 : vector<32x128xf32>
    %c0_8 = arith.constant 0 : index
    %c0_9 = arith.constant 0 : index
    %13 = vector.load %arg2[%c0_8, %c0_9] : memref<32x128xf32, #tpu.memory_space<vmem>>, vector<32x128xf32>
    tpu.vector_store %arg2[%c0_8, %c0_9], %12 {strides = array<i32>} : memref<32x128xf32, #tpu.memory_space<vmem>>, vector<32x128xf32>,
    return
  }
}

</mosaic_0001>

<bundles_post_ra>
// kernel: dqn_forward.1
= control target key start
LH: loop header
LB: loop body
LE: loop exit
PB: predicated region body
PF: predicated region fallthrough
CT: control target
= control target key end

     0   :  { %7 = vsyncpa [#allocation3], 0  ;;  %s313_s0 = inlined_call_operand.vmem [shape: f32[32,4], index: 0, kind: input, shape index: {}]   ;;  %s314_s1 = inlined_call_operand.hbm [shape: f32[152,128], index: 1, kind: input, shape index: {}]   ;;  %s315_s2 = inlined_call_operand.hbm [shape: f32[32,128], index: 2, kind: output, shape index: {}]  }
   0x1   :  { %8 = vsyncpa [#allocation4], 0  ;;  %s15_s11 = sshll.u32 %s314_s1, 4  ;;  %s266_s12 = smov [#allocation2]   ;;  %s16_s11 = int_to_ptr.hbm [resolvable:$true] %s15_s11 }
   0x2   :  { %s17_s13 = sshll.u32 %s266_s12, 4  ;;  %s267_s14 = smov 128   ;;  %s18_s13 = int_to_ptr.vmem [resolvable:$true] %s17_s13 }
   0x3   :  { %s268_s15 = smov 8  }
   0x4   :  { %23 = dma.hbm_to_vmem [thread:$0]  %s16_s11, 2432, %s18_s13, [#allocation3], %s267_s14, %s267_s14, %s268_s15  }
   0x5   :  { %262 = dma.done.wait [#allocation3], 2432  }
   0x6   :  { %263 = vsyncadd [#allocation3], 4294964864  ;;  %vm65_vm0 = vcmask 1043456   ;;  %vm52_vm1 = vcmask 31744   ;;  %v32_v0 = vld [vmem:[#allocation2] sm:$0xf] }
   0x7   :  { %v28_v1 = vld [vmem:[%s313_s0] sm:$0xff]  ;;  %155 = vmatpush.msk.msra.mxu0 %vm65_vm0, %v32_v0  ;;  %v50_v2 = vld [vmem:[#allocation2 + $0x90] sm:$0xff]  ;;  %v49_v3 = vld [vmem:[#allocation2 + $0x88] sm:$0xff]  ;;  %s142_s26 = sshll.u32 %s315_s2, 4  ;;  %s143_s26 = int_to_ptr.hbm [resolvable:$true] %s142_s26 }
   0x8   :  { %156 = vmatmul.msk.f32.vlgmr.msra.gmra.mxu0 %vm52_vm1, %v28_v1  ;;  %160 = vmatpush.msra.mxu1 %v50_v2  ;;  %v48_v4 = vld [vmem:[#allocation2 + $0x80] sm:$0xff]  ;;  %v47_v5 = vld [vmem:[#allocation2 + $0x78] sm:$0xff]  ;;  %v29_v6 = vld [vmem:[%s313_s0 + $0x8] sm:$0xff] }
   0x9   :  { %103 = vmatpush.msrb.mxu0 %v50_v2  ;;  %161 = vmatpush.msra.mxu2 %v50_v2  ;;  %v46_v7 = vld [vmem:[#allocation2 + $0x70] sm:$0xff]  ;;  %v45_v8 = vld [vmem:[#allocation2 + $0x68] sm:$0xff]  ;;  %v44_v9 = vld [vmem:[#allocation2 + $0x60] sm:$0xff] }
   0xa   :  { %163 = vmatpush.msra.mxu1 %v49_v3  ;;  %162 = vmatpush.msra.mxu3 %v50_v2  ;;  %v43_v10 = vld [vmem:[#allocation2 + $0x58] sm:$0xff]  ;;  %v30_v11 = vld [vmem:[%s313_s0 + $0x10] sm:$0xff]  ;;  %v41_v13 = vld [vmem:[#allocation2 + $0x48] sm:$0xff] }
   0xb   :  { %104 = vmatpush.msrb.mxu0 %v49_v3  ;;  %164 = vmatpush.msra.mxu2 %v49_v3  ;;  %v42_v12 = vld [vmem:[#allocation2 + $0x50] sm:$0xff]  ;;  %v40_v14 = vld [vmem:[#allocation2 + $0x40] sm:$0xff]  ;;  %v39_v15 = vld [vmem:[#allocation2 + $0x38] sm:$0xff] }
   0xc   :  { %166 = vmatpush.msra.mxu1 %v48_v4  ;;  %165 = vmatpush.msra.mxu3 %v49_v3  ;;  %v31_v16 = vld [vmem:[%s313_s0 + $0x18] sm:$0xff]  ;;  %v38_v17 = vld [vmem:[#allocation2 + $0x30] sm:$0xff]  ;;  %v37_v18 = vld [vmem:[#allocation2 + $0x28] sm:$0xff]  ;;  %s269_s0 = smov [#allocation5]  }
   0xd   :  { %105 = vmatpush.msrb.mxu0 %v48_v4  ;;  %167 = vmatpush.msra.mxu2 %v48_v4  ;;  %v36_v19 = vld [vmem:[#allocation2 + $0x20] sm:$0xff]  ;;  %v35_v20 = vld [vmem:[#allocation2 + $0x18] sm:$0xff]  ;;  %v212_v21 = vld [vmem:[#allocation2 + $0x8] ss:$0 sm:$0xff]  ;;  %s140_s23 = sshll.u32 %s269_s0, 4  ;;  %s141_s23 = int_to_ptr.vmem [resolvable:$true] %s140_s23 }
   0xe   :  { %169 = vmatpush.msra.mxu1 %v47_v5  ;;  %168 = vmatpush.msra.mxu3 %v48_v4  ;;  %v213_v34 = vld [vmem:[#allocation2 + $0x10] ss:$0 sm:$0xff] }
   0xf   :  { %106 = vmatpush.msrb.mxu0 %v47_v5  ;;  %170 = vmatpush.msra.mxu2 %v47_v5 }
  0x10   :  { %157 = vmatmul.msk.f32.gmra.mxu0 %vm52_vm1, %v29_v6  ;;  %172 = vmatpush.msra.mxu1 %v46_v7 }
  0x11   :  { %107 = vmatpush.msrb.mxu0 %v46_v7  ;;  %173 = vmatpush.msra.mxu2 %v46_v7 }
  0x12   :  { %175 = vmatpush.msra.mxu1 %v45_v8  ;;  %171 = vmatpush.msra.mxu3 %v47_v5 }
  0x13   :  { %108 = vmatpush.msrb.mxu0 %v45_v8  ;;  %176 = vmatpush.msra.mxu2 %v45_v8 }
  0x14   :  { %178 = vmatpush.msra.mxu1 %v44_v9  ;;  %174 = vmatpush.msra.mxu3 %v46_v7 }
  0x15   :  { %109 = vmatpush.msrb.mxu0 %v44_v9  ;;  %179 = vmatpush.msra.mxu2 %v44_v9 }
  0x16   :  { %181 = vmatpush.msra.mxu1 %v43_v10  ;;  %177 = vmatpush.msra.mxu3 %v45_v8 }
  0x17   :  { %110 = vmatpush.msrb.mxu0 %v43_v10  ;;  %182 = vmatpush.msra.mxu2 %v43_v10 }
  0x18   :  { %158 = vmatmul.msk.f32.gmra.mxu0 %vm52_vm1, %v30_v11  ;;  %184 = vmatpush.msra.mxu1 %v42_v12 }
  0x19   :  { %111 = vmatpush.msrb.mxu0 %v42_v12  ;;  %185 = vmatpush.msra.mxu2 %v42_v12 }
  0x1a   :  { %187 = vmatpush.msra.mxu1 %v41_v13  ;;  %180 = vmatpush.msra.mxu3 %v44_v9 }
  0x1b   :  { %112 = vmatpush.msrb.mxu0 %v41_v13  ;;  %188 = vmatpush.msra.mxu2 %v41_v13 }
  0x1c   :  { %190 = vmatpush.msra.mxu1 %v40_v14  ;;  %183 = vmatpush.msra.mxu3 %v43_v10 }
  0x1d   :  { %113 = vmatpush.msrb.mxu0 %v40_v14  ;;  %191 = vmatpush.msra.mxu2 %v40_v14 }
  0x1e   :  { %193 = vmatpush.msra.mxu1 %v39_v15  ;;  %186 = vmatpush.msra.mxu3 %v42_v12 }
  0x1f   :  { %114 = vmatpush.msrb.mxu0 %v39_v15  ;;  %194 = vmatpush.msra.mxu2 %v39_v15 }
  0x20   :  { %159 = vmatmul.msk.f32.gmra.mxu0 %vm52_vm1, %v31_v16  ;;  %196 = vmatpush.msra.mxu1 %v38_v17 }
  0x21   :  { %115 = vmatpush.msrb.mxu0 %v38_v17  ;;  %197 = vmatpush.msra.mxu2 %v38_v17 }
  0x22   :  { %189 = vmatpush.msra.mxu3 %v41_v13  ;;  %199 = vmatpush.msra.mxu1 %v37_v18 }
  0x23   :  { %116 = vmatpush.msrb.mxu0 %v37_v18  ;;  %200 = vmatpush.msra.mxu2 %v37_v18 }
  0x24   :  { %192 = vmatpush.msra.mxu3 %v40_v14  ;;  %202 = vmatpush.msra.mxu1 %v36_v19 }
  0x25   :  { %117 = vmatpush.msrb.mxu0 %v36_v19  ;;  %203 = vmatpush.msra.mxu2 %v36_v19 }
  0x26   :  { %195 = vmatpush.msra.mxu3 %v39_v15  ;;  %205 = vmatpush.msra.mxu1 %v35_v20 }
  0x27   :  { %118 = vmatpush.msrb.mxu0 %v35_v20  ;;  %206 = vmatpush.msra.mxu2 %v35_v20 }
  0x28   :  { %198 = vmatpush.msra.mxu3 %v38_v17 }
  0x2a   :  { %201 = vmatpush.msra.mxu3 %v37_v18 }
  0x2c   :  { %204 = vmatpush.msra.mxu3 %v36_v19 }
  0x2e   :  { %207 = vmatpush.msra.mxu3 %v35_v20 }
  0x85   :  { %v86_v22 = vpop.f32.mrf.mxu0 }
  0x86   :  { %v87_v23 = vadd.f32 %v212_v21, %v86_v22 }
  0x88   :  { %v98_v24 = vmax.f32 %v87_v23, 0.0 }
  0x8a   :  { %119 = vmatmul.f32.vlgmr.msrb.gmra.mxu0 %v98_v24 }
  0x8d   :  { %v89_v25 = vpop.f32.mrf.mxu0 }
  0x8e   :  { %v90_v26 = vadd.f32 %v212_v21, %v89_v25 }
  0x90   :  { %v99_v27 = vmax.f32 %v90_v26, 0.0 }
  0x92   :  { %122 = vmatmul.f32.vlgmr.msra.gmra.mxu1 %v99_v27 }
  0x95   :  { %v92_v28 = vpop.f32.mrf.mxu0 }
  0x96   :  { %v93_v29 = vadd.f32 %v212_v21, %v92_v28 }
  0x98   :  { %v100_v30 = vmax.f32 %v93_v29, 0.0 }
  0x9a   :  { %125 = vmatmul.f32.vlgmr.msra.gmra.mxu2 %v100_v30 }
  0x9d   :  { %v95_v31 = vpop.f32.mrf.mxu0 }
  0x9e   :  { %v96_v32 = vadd.f32 %v212_v21, %v95_v31 }
  0xa0   :  { %v101_v33 = vmax.f32 %v96_v32, 0.0 }
  0xa2   :  { %128 = vmatmul.f32.vlgmr.msra.gmra.mxu3 %v101_v33 }
 0x107   :  { %v120_v35 = vpop.f32.mrf.mxu0 }
 0x108   :  { %v121_v36 = vadd.f32 %v213_v34, %v120_v35 }
 0x10a   :  { %132 = vst [vmem:[#allocation5] sm:$0xff] %v121_v36 }
 0x10f   :  { %v123_v37 = vpop.f32.mrf.mxu1 }
 0x110   :  { %v124_v38 = vadd.f32 %v213_v34, %v123_v37 }
 0x112   :  { %133 = vst [vmem:[#allocation5 + $0x8] sm:$0xff] %v124_v38 }
 0x11d   :  { %v126_v39 = vpop.f32.mrf.mxu2 }
 0x11e   :  { %v127_v40 = vadd.f32 %v213_v34, %v126_v39 }
 0x120   :  { %134 = vst [vmem:[#allocation5 + $0x10] sm:$0xff] %v127_v40 }
 0x125   :  { %v129_v41 = vpop.f32.mrf.mxu3 }
 0x126   :  { %v130_v42 = vadd.f32 %v213_v34, %v129_v41 }
 0x128   :  { %135 = vst [vmem:[#allocation5 + $0x18] sm:$0xff] %v130_v42 }
 0x129   :  { %148 = dma.vmem_to_hbm [thread:$0]  %s141_s23, 512, %s143_s26, [#allocation4], %s267_s14, %s267_s14, %s268_s15  }
 0x12a   :  { %264 = dma.done.wait [#allocation4], 512  }
 0x12b   :  { %265 = vsyncadd [#allocation4], 4294966784 }
 0x12c   :  { %153 = vsyncpa [#allocation3], 1 }
 0x12d   :  { %154 = vsyncpa [#allocation4], 1 }

</bundles_post_ra>
